<compile_context>
chip_gen: v5e
topology: v5e:2x2
jax: 0.10.0
libtpu: 0.0.40
codegen_flags: <defaults>
</compile_context>

<pallas_src>
import jax
import jax.numpy as jnp
from jax import lax
from jax.experimental import pallas as pl
from jax.experimental.pallas import tpu as pltpu


def _round_up(x, m):
    return ((x + m - 1) // m) * m


def _encode_feat_kernel(x_ref, wt_ref, out_ref):
    """Hot path of MatAutoEncoder.encode_feat for a tile of Bt batch elements.

    x_ref  : (Bt, N, N) VMEM tile  -- Bt batch elements of x
    wt_ref : (N, M)     VMEM tile  -- W1^T (same block every grid step)
    out_ref: (Bt*M, M)  VMEM tile  -- packed rows of the Bt c-matrices
    """
    Bt, N, _ = x_ref.shape
    M = wt_ref.shape[1]
    wt = wt_ref[...]                                               # (N, M)

    # Stage 1 (MXU): z = x @ W1^T, all Bt batch elements fused into one matmul.
    # N is padded to a multiple of 8, so this reshape is a pure relabel.
    x2 = x_ref[...].reshape(Bt * N, N)                             # (Bt*N, N)
    z = jnp.dot(x2, wt, preferred_element_type=jnp.float32)        # (Bt*N, M)

    # Stage 2 (MXU, transposed-LHS mode): c_b = z_b^T @ W1^T.
    # Contract the N axis of z_b directly -- no explicit z.T materialization.
    cs = []
    for b in range(Bt):                                            # static unroll
        z_b = z[b * N:(b + 1) * N, :]                              # (N, M)
        c_b = lax.dot_general(
            z_b, wt,
            dimension_numbers=(((0,), (0,)), ((), ())),            # contract N<->N
            preferred_element_type=jnp.float32)                    # (M, M)
        cs.append(c_b)

    # Single full-tile store of the packed (Bt*M, M) slab.
    out_ref[...] = jnp.concatenate(cs, axis=0).astype(out_ref.dtype)


def _pick_block_b(B, n_pad, m_pad, tile_budget_bytes=24 * 1024 * 1024):
    """Batch elements per grid step, sized against a conservative VMEM budget
    (fits the 32 MiB scoped default on v7x; plenty of headroom on v5e/v6e)."""
    # f32 bytes per batch element: double-buffered x tile + double-buffered
    # packed output tile + stage-1/stage-2 intermediates.
    per_b = 4 * (2 * n_pad * n_pad + 2 * m_pad * m_pad + 2 * n_pad * m_pad)
    bt = max(1, min(B, tile_budget_bytes // per_b))
    return int(bt)


def encode_features_pallas(x, w1, *, block_b=None):
    """x: (B, N, N) float32, w1: (M, N) float32  ->  (B, M, M) float32."""
    B, N, N2 = x.shape
    assert N == N2, "x must be (B, N, N)"
    M, N_w = w1.shape
    assert N_w == N, "w1 must be (M, N)"

    # Pad N and M to multiples of 8 (sublane) so in-kernel reshapes are free.
    # Zero padding is exact: padded rows/cols of W1^T contribute zeros only.
    n_pad = _round_up(N, 8)
    m_pad = _round_up(M, 8)

    bt = block_b if block_b is not None else _pick_block_b(B, n_pad, m_pad)
    nb = pl.cdiv(B, bt)
    if nb > 1 and nb % 2 == 1:
        # Even grid length keeps both v7x TensorCores busy (no-op on v5e/v6e).
        nb += 1
        bt = pl.cdiv(B, nb)
        nb = pl.cdiv(B, bt)
    b_pad = nb * bt

    xp = x.astype(jnp.float32)
    if (b_pad, n_pad) != (B, N):
        xp = jnp.pad(xp, ((0, b_pad - B), (0, n_pad - N), (0, n_pad - N)))
    w1p = w1.astype(jnp.float32)
    if (m_pad, n_pad) != (M, N):
        w1p = jnp.pad(w1p, ((0, m_pad - M), (0, n_pad - N)))
    wt = w1p.T                                                     # (n_pad, m_pad)

    flops = 2 * b_pad * (n_pad * n_pad * m_pad + n_pad * m_pad * m_pad)
    bytes_accessed = 4 * (b_pad * n_pad * n_pad + n_pad * m_pad
                          + b_pad * m_pad * m_pad)

    out_packed = pl.pallas_call(
        _encode_feat_kernel,
        out_shape=jax.ShapeDtypeStruct((b_pad * m_pad, m_pad), jnp.float32),
        grid=(nb,),
        in_specs=[
            pl.BlockSpec((bt, n_pad, n_pad), lambda b: (b, 0, 0)),
            # Tiny weight, reused every step; constant index_map keeps it
            # resident (pl.Buffered(1) would shave one buffer, not needed here).
            pl.BlockSpec((n_pad, m_pad), lambda b: (0, 0)),
        ],
        out_specs=pl.BlockSpec((bt * m_pad, m_pad), lambda b: (b, 0)),
        compiler_params=pltpu.CompilerParams(
            dimension_semantics=("parallel",),
            vmem_limit_bytes=32 * 1024 * 1024,
        ),
        cost_estimate=pl.CostEstimate(
            flops=flops, transcendentals=0, bytes_accessed=bytes_accessed),
    )(xp, wt)

    # Unpack (b_pad*m_pad, m_pad) slab -> (B, M, M); slicing drops the padding.
    return out_packed.reshape(b_pad, m_pad, m_pad)[:B, :M, :M]


def pheno_proj_forward(x, y, w1):
    """PhenoProj.forward: returns (x_embedding, y_embedding)."""
    x_embedding = encode_features_pallas(x, w1)
    # TODO(synk): encode_targets is undefined in the reference module; passthrough.
    y_embedding = y
    return x_embedding, y_embedding


def _reference_encode_features(x, w1):
    # Pure-JAX reference of MatAutoEncoder.encode_feat (cfg.ReEig = False).
    z = jnp.einsum("bij,mj->bim", x, w1)        # enc_mat1(x)            (B, N, M)
    c = jnp.einsum("bnm,kn->bmk", z, w1)        # enc_mat2(z.permute(0,2,1)) (B, M, M)
    return c


if __name__ == "__main__":
    # Small shapes consistent with the module:
    #   batch=2, input_dim_feat=16, output_dim_feat=8, input_dim_target=4
    B, N, M, T = 2, 16, 8, 4

    key = jax.random.PRNGKey(0)
    kx, ky, kw = jax.random.split(key, 3)

    # Symmetric connectivity-like input matrices (B, N, N).
    x_raw = jax.random.normal(kx, (B, N, N), dtype=jnp.float32)
    x = 0.5 * (x_raw + jnp.swapaxes(x_raw, 1, 2))

    # Phenotype targets (B, T).
    y = jax.random.normal(ky, (B, T), dtype=jnp.float32)

    # enc_mat1 weight, PyTorch nn.Linear default init: U(-1/sqrt(N), 1/sqrt(N)).
    bound = 1.0 / jnp.sqrt(jnp.float32(N))
    w1 = jax.random.uniform(kw, (M, N), dtype=jnp.float32,
                            minval=-bound, maxval=bound)

    x_emb, y_emb = pheno_proj_forward(x, y, w1)
    jax.block_until_ready((x_emb, y_emb))

    # Correctness check against a pure-JAX reference.
    ref = _reference_encode_features(x, w1)
    assert x_emb.shape == (B, M, M)
    assert y_emb.shape == (B, T)
    assert jnp.allclose(x_emb, ref, atol=1e-4, rtol=1e-4), "mismatch vs reference"

    print("KERNEL_OK")
</pallas_src>

<mosaic_0001>
module attributes {stable_mosaic.version = 11 : i64} {
  func.func @_encode_feat_kernel(%arg0: i32, %arg1: memref<2x16x16xf32, #tpu.memory_space<vmem>>, %arg2: memref<16x8xf32, #tpu.memory_space<vmem>>, %arg3: memref<16x8xf32, #tpu.memory_space<vmem>>) attributes {dimension_semantics = [#tpu.dimension_semantics<parallel>], iteration_bounds = array<i64: 1>, scalar_prefetch = 0 : i64, scratch_operands = 0 : i64, tpu.core_type = #tpu.core_type<tc>, window_params = [{transform_indices = @transform_0, window_bounds = array<i64: 2, 16, 16>}, {pipeline_mode = #tpu.pipeline_mode<synchronous>, transform_indices = @transform_1, window_bounds = array<i64: 16, 8>}, {transform_indices = @transform_2, window_bounds = array<i64: 16, 8>}]} {
    %c0 = arith.constant 0 : index
    %c0_0 = arith.constant 0 : index
    %0 = vector.load %arg2[%c0, %c0_0] : memref<16x8xf32, #tpu.memory_space<vmem>>, vector<16x8xf32>
    %c0_1 = arith.constant 0 : index
    %c0_2 = arith.constant 0 : index
    %c0_3 = arith.constant 0 : index
    %1 = vector.load %arg1[%c0_1, %c0_2, %c0_3] : memref<2x16x16xf32, #tpu.memory_space<vmem>>, vector<2x16x16xf32>
    %2 = vector.shape_cast %1 : vector<2x16x16xf32> to vector<32x16xf32>
    %cst = arith.constant dense<0.000000e+00> : vector<32x8xf32>
    %3 = tpu.matmul %2, %0, %cst {dimension_numbers = #tpu.dot_dimension_numbers<[1], [0], [0], [1], [0, 0, 1, 1], [], []>} : vector<32x16xf32>, vector<16x8xf32>, vector<32x8xf32> -> vector<32x8xf32>
    %4 = vector.extract_strided_slice %3 {offsets = [0, 0], sizes = [16, 8], strides = [1, 1]} : vector<32x8xf32> to vector<16x8xf32>
    %cst_4 = arith.constant dense<0.000000e+00> : vector<8x8xf32>
    %5 = tpu.matmul %4, %0, %cst_4 {dimension_numbers = #tpu.dot_dimension_numbers<[0], [0], [1], [1], [0, 1, 1, 1], [], []>} : vector<16x8xf32>, vector<16x8xf32>, vector<8x8xf32> -> vector<8x8xf32>
    %6 = vector.extract_strided_slice %3 {offsets = [16, 0], sizes = [16, 8], strides = [1, 1]} : vector<32x8xf32> to vector<16x8xf32>
    %cst_5 = arith.constant dense<0.000000e+00> : vector<8x8xf32>
    %7 = tpu.matmul %6, %0, %cst_5 {dimension_numbers = #tpu.dot_dimension_numbers<[0], [0], [1], [1], [0, 1, 1, 1], [], []>} : vector<16x8xf32>, vector<16x8xf32>, vector<8x8xf32> -> vector<8x8xf32>
    %8 = tpu.concatenate %5, %7 in 0 : vector<8x8xf32>, vector<8x8xf32> -> vector<16x8xf32>
    %c0_6 = arith.constant 0 : index
    %c0_7 = arith.constant 0 : index
    %9 = vector.load %arg3[%c0_6, %c0_7] : memref<16x8xf32, #tpu.memory_space<vmem>>, vector<16x8xf32>
    tpu.vector_store %arg3[%c0_6, %c0_7], %8 {strides = array<i32>} : memref<16x8xf32, #tpu.memory_space<vmem>>, vector<16x8xf32>,
    return
  }
  func.func @transform_0(%arg0: i32) -> (i32, i32, i32) {
    %c0_i32 = arith.constant 0 : i32
    %c0_i32_0 = arith.constant 0 : i32
    %c0_i32_1 = arith.constant 0 : i32
    return %arg0, %c0_i32, %c0_i32_0 : i32, i32, i32
  }
  func.func @transform_1(%arg0: i32) -> (i32, i32) {
    %c0_i32 = arith.constant 0 : i32
    %c0_i32_0 = arith.constant 0 : i32
    %c0_i32_1 = arith.constant 0 : i32
    return %c0_i32, %c0_i32_0 : i32, i32
  }
  func.func @transform_2(%arg0: i32) -> (i32, i32) {
    %c0_i32 = arith.constant 0 : i32
    %c0_i32_0 = arith.constant 0 : i32
    return %arg0, %c0_i32 : i32, i32
  }
}

</mosaic_0001>

<bundles_post_ra>
// kernel: tpu_custom_call.1
= control target key start
LH: loop header
LB: loop body
LE: loop exit
PB: predicated region body
PF: predicated region fallthrough
CT: control target
= control target key end

     0   :  { %7 = vsyncpa [#allocation3], 0  ;;  %s231_s12 = smov [#allocation2]   ;;  %s232_s14 = smov 128   ;;  %s270_s0 = inlined_call_operand.hbm [shape: f32[2,16,16], index: 0, kind: input, shape index: {}]   ;;  %s271_s1 = inlined_call_operand.vmem [shape: f32[16,8], index: 1, kind: input, shape index: {}]   ;;  %s272_s2 = inlined_call_operand.vmem [shape: f32[16,8], index: 2, kind: output, shape index: {}]  }
   0x1   :  { %s12_s11 = sshll.u32 %s270_s0, 4  ;;  %s14_s13 = sshll.u32 %s231_s12, 4  ;;  %s13_s11 = int_to_ptr.hbm [resolvable:$true] %s12_s11  ;;  %s15_s13 = int_to_ptr.vmem [resolvable:$true] %s14_s13 }
   0x2   :  { %s233_s15 = smov 8  }
   0x3   :  { %20 = dma.hbm_to_vmem [thread:$0]  %s13_s11, 512, %s15_s13, [#allocation3], %s232_s14, %s232_s14, %s233_s15  }
   0x4   :  { %229 = dma.done.wait [#allocation3], 512  }
   0x5   :  { %230 = vsyncadd [#allocation3], 4294966784  ;;  %v28_v0 = vld [vmem:[%s271_s1 + $0x8] sm:$0xff]  ;;  %v27_v1 = vld [vmem:[%s271_s1] sm:$0xff]  ;;  %vm33_vm0 = vcmask 130048   ;;  %vm185_vm1 = vcmask 64512  }
   0x6   :  { %199 = vmatpush.msra.mxu3 %v28_v0  ;;  %v31_v2 = vld [vmem:[#allocation2 + $0x10] sm:$0xff]  ;;  %60 = vmatpush.msra.mxu0 %v28_v0  ;;  %v29_v3 = vld [vmem:[#allocation2] sm:$0xff]  ;;  %v32_v4 = vld [vmem:[#allocation2 + $0x18] sm:$0xff] }
   0x7   :  { %179 = vmatpush.msra.mxu2 %v28_v0  ;;  %124 = vmatpush.msra.mxu1 %v28_v0  ;;  %v30_v5 = vld [vmem:[#allocation2 + $0x8] sm:$0xff] }
   0x8   :  { %200 = vmatpush.msra.mxu3 %v27_v1  ;;  %61 = vmatpush.msra.mxu0 %v27_v1 }
   0x9   :  { %195 = vmatmul.msk.f32.vlgmr.msra.gmra.mxu3 %vm33_vm0, %v31_v2  ;;  %193 = vmatmul.msk.f32.vlgmr.msra.gmra.mxu0 %vm33_vm0, %v29_v3 }
   0xa   :  { %180 = vmatpush.msra.mxu2 %v27_v1  ;;  %125 = vmatpush.msra.mxu1 %v27_v1 }
  0x11   :  { %196 = vmatmul.msk.f32.gmra.mxu3 %vm33_vm0, %v32_v4  ;;  %194 = vmatmul.msk.f32.gmra.mxu0 %vm33_vm0, %v30_v5 }
  0x86   :  { %v63_v6 = vpop.f32.mrf.mxu0 }
  0x87   :  { %75 = vxpose.xlu1.b32.start [1/2] (short) (narrow) %v63_v6, 8 }
  0x8c   :  { %v69_v7 = vpop.f32.mrf.mxu3 }
  0x8d   :  { %130 = vxpose.xlu0.b32.start [1/2] (short) (narrow) %v69_v7, 8 }
  0x8e   :  { %v66_v8 = vpop.f32.mrf.mxu0 }
  0x8f   :  { %76 = vxpose.xlu1.b32.end [2/2] (short) (narrow) %v66_v8, 8 }
  0x94   :  { %v72_v9 = vpop.f32.mrf.mxu3 }
  0x95   :  { %131 = vxpose.xlu0.b32.end [2/2] (short) (narrow) %v72_v9, 8 }
 0x12b   :  { %v91_v10 = vpop.trf.xlu1 }
 0x12c   :  { %197 = vmatmul.msk.f32.vlgmr.msra.gmra.mxu1 %vm33_vm0, %v91_v10 }
 0x131   :  { %v146_v11 = vpop.trf.xlu0 }
 0x132   :  { %198 = vmatmul.msk.f32.vlgmr.msra.gmra.mxu2 %vm33_vm0, %v146_v11 }
 0x1a9   :  { %v127_v12 = vpop.f32.mrf.mxu1 }
 0x1aa   :  { %186 = vst.msk [vmem:[%s272_s2] sm:$0xff] %vm185_vm1, %v127_v12 }
 0x1b5   :  { %v182_v13 = vpop.f32.mrf.mxu2 }
 0x1b6   :  { %187 = vst.msk [vmem:[%s272_s2 + $0x8] sm:$0xff] %vm185_vm1, %v182_v13 }
 0x1b7   :  { %192 = vsyncpa [#allocation3], 1 }

</bundles_post_ra>
